<compile_context>
chip_gen: v5e
topology: v5e:2x2
jax: 0.10.0
libtpu: 0.0.40
codegen_flags: <defaults>
</compile_context>

<pallas_src>
import numpy as np

import jax
import jax.numpy as jnp
from jax import lax
from jax.experimental import pallas as pl
from jax.experimental.pallas import tpu as pltpu


LANES = 128  # lane-dense output width for every matmul


def _round_up(x, m):
    return (x + m - 1) // m * m


def _cdiv(a, b):
    return (a + b - 1) // b


def _pick_row_tile(m, cap=1024):
    """Row tile: multiple of 16 (bf16 sublane packing), capped for VMEM,
    sized for ~4 grid steps so v7x's 2 TensorCores both get work."""
    if m <= 32:
        return _round_up(m, 16)
    return max(16, min(cap, _round_up(_cdiv(m, 4), 16)))


# ----------------------------------------------------------------------------
# Pallas kernels
# ----------------------------------------------------------------------------
def _conv_relu_pool_kernel(pa_ref, pb_ref, pc_ref, pd_ref, w_ref, b_ref, o_ref):
    """Fused conv-as-matmul + bias + ReLU + 2x2 max-pool epilogue.

    pa..pd: (tm, K) bf16 im2col slabs, one per position in the 2x2 pool window
            (row r of every slab belongs to the same pooled output pixel).
    w: (K, 128) bf16, b: (1, 128) f32, o: (tm, 128) bf16 pooled output rows.
    """
    w = w_ref[...]
    b = b_ref[...]

    def branch(p_ref):
        acc = jnp.dot(p_ref[...], w, preferred_element_type=jnp.float32)
        return jnp.maximum(acc + b, 0.0)

    out = jnp.maximum(jnp.maximum(branch(pa_ref), branch(pb_ref)),
                      jnp.maximum(branch(pc_ref), branch(pd_ref)))
    o_ref[...] = out.astype(o_ref.dtype)


def _fc_fused_kernel(x_ref, w1_ref, b1_ref, w2_ref, b2_ref, w3_ref, b3_ref,
                     o_ref):
    """fc1 + ReLU -> fc2 + ReLU -> fc3; bf16 MXU operands, f32 accumulation."""
    h = jnp.dot(x_ref[...], w1_ref[...], preferred_element_type=jnp.float32)
    h = jnp.maximum(h + b1_ref[...], 0.0)
    h = jnp.dot(h.astype(jnp.bfloat16), w2_ref[...],
                preferred_element_type=jnp.float32)
    h = jnp.maximum(h + b2_ref[...], 0.0)
    h = jnp.dot(h.astype(jnp.bfloat16), w3_ref[...],
                preferred_element_type=jnp.float32)
    o_ref[...] = (h + b3_ref[...]).astype(o_ref.dtype)


# ----------------------------------------------------------------------------
# Pallas wrappers
# ----------------------------------------------------------------------------
def conv_relu_pool(slabs, w2d, bias, oc):
    """Pooled conv stage: out[r] = max_d relu(slabs[d][r] @ w2d + bias).

    slabs: 4 arrays (M, K) bf16 (pool-window im2col slabs); w2d: (K, oc);
    bias: (oc,).  Returns (M, 128) bf16; columns >= oc are exactly zero.
    """
    M, K = slabs[0].shape
    w_p = jnp.zeros((K, LANES), jnp.bfloat16).at[:, :oc].set(
        w2d.astype(jnp.bfloat16))
    b_p = jnp.zeros((1, LANES), jnp.float32).at[:, :oc].set(
        bias.astype(jnp.float32))

    tm = _pick_row_tile(M, cap=1024)
    m_pad = _round_up(M, tm)
    if m_pad != M:
        slabs = [jnp.pad(s, ((0, m_pad - M), (0, 0))) for s in slabs]

    out = pl.pallas_call(
        _conv_relu_pool_kernel,
        out_shape=jax.ShapeDtypeStruct((m_pad, LANES), jnp.bfloat16),
        grid=(m_pad // tm,),
        in_specs=[pl.BlockSpec((tm, K), lambda i: (i, 0)) for _ in range(4)]
        + [pl.BlockSpec((K, LANES), lambda i: (0, 0)),      # weights resident
           pl.BlockSpec((1, LANES), lambda i: (0, 0))],     # bias resident
        out_specs=pl.BlockSpec((tm, LANES), lambda i: (i, 0)),
        compiler_params=pltpu.CompilerParams(
            dimension_semantics=("parallel",),
            vmem_limit_bytes=32 * 1024 * 1024,
        ),
    )(*slabs, w_p, b_p)
    return out[:M]


def _pad_mylinear(w, b, in_pad, out_pad, row_perm=None):
    """mylinear intended semantics: y = x @ w.view(in_s, out_s) + b (scalar).

    torch .view == reshape (NOT transpose).  `row_perm` optionally permutes the
    input-feature rows (used to fold the NCHW->NHWC flatten into fc1's weight).
    """
    out_s, in_s = w.shape
    w_v = w.reshape(in_s, out_s)
    if row_perm is not None:
        w_v = w_v[row_perm, :]
    wp = jnp.zeros((in_pad, out_pad), jnp.bfloat16).at[:in_s, :out_s].set(
        w_v.astype(jnp.bfloat16))
    bp = jnp.zeros((1, out_pad), jnp.float32).at[:, :out_s].set(
        b.astype(jnp.float32))
    return wp, bp


def fc_fused(x, params):
    """Fused fc1+ReLU -> fc2+ReLU -> fc3, gridded over batch rows.

    x: (B, 400) bf16 features in NHWC (h, w, c) flatten order; fc1's weight
    rows are permuted once so no activation transpose is needed.
    """
    B, K = x.shape                                     # (B, 400)
    C, H, W = 16, 5, 5
    # perm[h*W*C + w*C + c] = c*H*W + h*W + w   (NHWC row -> original CHW row)
    perm = jnp.transpose(jnp.arange(C * H * W).reshape(C, H, W),
                         (1, 2, 0)).reshape(-1)
    w1p, b1p = _pad_mylinear(params["fc1_w"], params["fc1_b"], K, LANES,
                             row_perm=perm)
    w2p, b2p = _pad_mylinear(params["fc2_w"], params["fc2_b"], LANES, LANES)
    w3p, b3p = _pad_mylinear(params["fc3_w"], params["fc3_b"], LANES, LANES)

    tb = _pick_row_tile(B, cap=512)
    b_pad = _round_up(B, tb)
    xp = x.astype(jnp.bfloat16)
    if b_pad != B:
        xp = jnp.pad(xp, ((0, b_pad - B), (0, 0)))

    out = pl.pallas_call(
        _fc_fused_kernel,
        out_shape=jax.ShapeDtypeStruct((b_pad, LANES), jnp.float32),
        grid=(b_pad // tb,),
        in_specs=[
            pl.BlockSpec((tb, K), lambda i: (i, 0)),         # activations
            pl.BlockSpec((K, LANES), lambda i: (0, 0)),      # w1 resident
            pl.BlockSpec((1, LANES), lambda i: (0, 0)),
            pl.BlockSpec((LANES, LANES), lambda i: (0, 0)),  # w2 resident
            pl.BlockSpec((1, LANES), lambda i: (0, 0)),
            pl.BlockSpec((LANES, LANES), lambda i: (0, 0)),  # w3 resident
            pl.BlockSpec((1, LANES), lambda i: (0, 0)),
        ],
        out_specs=pl.BlockSpec((tb, LANES), lambda i: (i, 0)),
        compiler_params=pltpu.CompilerParams(
            dimension_semantics=("parallel",),
            vmem_limit_bytes=32 * 1024 * 1024,
        ),
    )(xp, w1p, b1p, w2p, b2p, w3p, b3p)
    return out[:B, :10]


# ----------------------------------------------------------------------------
# JAX glue: pool-window im2col + full forward
# ----------------------------------------------------------------------------
def _pool_window_patches(x_nhwc, k, pad):
    """Four im2col slabs, one per position inside the 2x2 max-pool window.

    Slab d = (dy, dx) has shape (B, OH//2, OW//2, C*k*k); row (b, i, j) holds
    the conv patch at conv-output position (2i+dy, 2j+dx).  Features are
    channel-major (c, kh, kw), matching PyTorch weight.reshape(OC, IC*KH*KW).
    Built with stride-2 patches on the (small) input image, so the pre-pool
    conv output never has to be materialised.
    """
    if pad:
        x_nhwc = jnp.pad(x_nhwc, ((0, 0), (pad, pad), (pad, pad), (0, 0)))
    slabs = []
    for dy in (0, 1):
        for dx in (0, 1):
            slabs.append(lax.conv_general_dilated_patches(
                x_nhwc[:, dy:, dx:, :], (k, k), (2, 2), "VALID",
                dimension_numbers=("NHWC", "HWIO", "NHWC")))
    return slabs


def dnn_forward(params, x):
    B = x.shape[0]
    x_nhwc = jnp.transpose(x, (0, 2, 3, 1)).astype(jnp.bfloat16)   # (B,28,28,1)

    # conv1: Conv2d(1, 6, 5, stride=1, pad=2) + ReLU + MaxPool(2, 2) — fused
    slabs1 = _pool_window_patches(x_nhwc, k=5, pad=2)              # 4x(B,14,14,25)
    slabs1 = [s.reshape(B * 14 * 14, 25) for s in slabs1]
    w1 = params["conv1_w"].reshape(6, 25).T                        # (25, 6)
    y1 = conv_relu_pool(slabs1, w1, params["conv1_b"], oc=6)       # (B*196,128) bf16
    x2 = y1.reshape(B, 14, 14, LANES)[..., :6]                     # (B,14,14,6)

    # conv2: Conv2d(6, 16, 5) + ReLU + MaxPool(2, 2) — fused
    slabs2 = _pool_window_patches(x2, k=5, pad=0)                  # 4x(B,5,5,150)
    slabs2 = [s.reshape(B * 5 * 5, 150) for s in slabs2]
    w2 = params["conv2_w"].reshape(16, 150).T                      # (150, 16)
    y2 = conv_relu_pool(slabs2, w2, params["conv2_b"], oc=16)      # (B*25,128) bf16

    # flatten in NHWC (h, w, c) order; fc1 weight rows are permuted to match
    feats = y2.reshape(B, 5, 5, LANES)[..., :16].reshape(B, 16 * 5 * 5)

    # fused fc1 + ReLU -> fc2 + ReLU -> fc3 (mylinear intended semantics)
    return fc_fused(feats, params)


def dnn_forward_ref(params, x):
    """Pure-XLA float32 reference with identical (intended) semantics."""
    dn = ("NCHW", "OIHW", "NCHW")
    y = lax.conv_general_dilated(x, params["conv1_w"], (1, 1),
                                 [(2, 2), (2, 2)], dimension_numbers=dn)
    y = jnp.maximum(y + params["conv1_b"][None, :, None, None], 0.0)
    y = lax.reduce_window(y, -jnp.inf, lax.max, (1, 1, 2, 2), (1, 1, 2, 2),
                          "VALID")
    y = lax.conv_general_dilated(y, params["conv2_w"], (1, 1),
                                 [(0, 0), (0, 0)], dimension_numbers=dn)
    y = jnp.maximum(y + params["conv2_b"][None, :, None, None], 0.0)
    y = lax.reduce_window(y, -jnp.inf, lax.max, (1, 1, 2, 2), (1, 1, 2, 2),
                          "VALID")
    feats = y.reshape(y.shape[0], -1)                  # NCHW flatten (c, h, w)

    def mylin(v, w, b):
        return v @ w.reshape(v.shape[-1], w.shape[0]) + b

    h = jnp.maximum(mylin(feats, params["fc1_w"], params["fc1_b"]), 0.0)
    h = jnp.maximum(mylin(h, params["fc2_w"], params["fc2_b"]), 0.0)
    return mylin(h, params["fc3_w"], params["fc3_b"])


def init_params(key):
    ks = jax.random.split(key, 10)
    p = {}
    # Conv2d-style small uniform init (deterministic, synthetic).
    p["conv1_w"] = jax.random.uniform(ks[0], (6, 1, 5, 5), jnp.float32, -0.2, 0.2)
    p["conv1_b"] = jax.random.uniform(ks[1], (6,), jnp.float32, -0.2, 0.2)
    p["conv2_w"] = jax.random.uniform(ks[2], (16, 6, 5, 5), jnp.float32, -0.08, 0.08)
    p["conv2_b"] = jax.random.uniform(ks[3], (16,), jnp.float32, -0.08, 0.08)
    # mylinear: w = torch.rand([out, in]) in [0,1); b = torch.rand(1) scalar.
    p["fc1_w"] = jax.random.uniform(ks[4], (120, 16 * 5 * 5), jnp.float32)
    p["fc1_b"] = jax.random.uniform(ks[5], (1,), jnp.float32)
    p["fc2_w"] = jax.random.uniform(ks[6], (84, 120), jnp.float32)
    p["fc2_b"] = jax.random.uniform(ks[7], (1,), jnp.float32)
    p["fc3_w"] = jax.random.uniform(ks[8], (10, 84), jnp.float32)
    p["fc3_b"] = jax.random.uniform(ks[9], (1,), jnp.float32)
    return p


if __name__ == "__main__":
    key = jax.random.PRNGKey(0)
    pkey, xkey = jax.random.split(key)
    params = init_params(pkey)
    # Input must be (B, 1, 28, 28) so the flatten yields 16*5*5 = 400 features.
    x = jax.random.normal(xkey, (2, 1, 28, 28), dtype=jnp.float32)

    out = jax.jit(dnn_forward)(params, x)
    out = jax.block_until_ready(out)
    assert out.shape == (2, 10), out.shape
    assert out.dtype == jnp.float32
    assert bool(jnp.all(jnp.isfinite(out)))

    # Tolerance check vs. a pure-XLA reference (bf16 MXU operands in kernels).
    ref = jax.block_until_ready(jax.jit(dnn_forward_ref)(params, x))
    np.testing.assert_allclose(np.asarray(out), np.asarray(ref),
                               rtol=1e-1, atol=1.0)
    print("KERNEL_OK")
</pallas_src>

<mosaic_0001>
module attributes {stable_mosaic.version = 11 : i64} {
  func.func @_conv_relu_pool_kernel(%arg0: i32, %arg1: memref<112x25xbf16, #tpu.memory_space<vmem>>, %arg2: memref<112x25xbf16, #tpu.memory_space<vmem>>, %arg3: memref<112x25xbf16, #tpu.memory_space<vmem>>, %arg4: memref<112x25xbf16, #tpu.memory_space<vmem>>, %arg5: memref<25x128xbf16, #tpu.memory_space<vmem>>, %arg6: memref<1x128xf32, #tpu.memory_space<vmem>>, %arg7: memref<112x128xbf16, #tpu.memory_space<vmem>>) attributes {dimension_semantics = [#tpu.dimension_semantics<parallel>], iteration_bounds = array<i64: 4>, scalar_prefetch = 0 : i64, scratch_operands = 0 : i64, tpu.core_type = #tpu.core_type<tc>, window_params = [{transform_indices = @transform_0, window_bounds = array<i64: 112, 25>}, {transform_indices = @transform_1, window_bounds = array<i64: 112, 25>}, {transform_indices = @transform_2, window_bounds = array<i64: 112, 25>}, {transform_indices = @transform_3, window_bounds = array<i64: 112, 25>}, {pipeline_mode = #tpu.pipeline_mode<synchronous>, transform_indices = @transform_4, window_bounds = array<i64: 25, 128>}, {pipeline_mode = #tpu.pipeline_mode<synchronous>, transform_indices = @transform_5, window_bounds = array<i64: 1, 128>}, {transform_indices = @transform_6, window_bounds = array<i64: 112, 128>}]} {
    %c0 = arith.constant 0 : index
    %c0_0 = arith.constant 0 : index
    %0 = vector.load %arg5[%c0, %c0_0] : memref<25x128xbf16, #tpu.memory_space<vmem>>, vector<25x128xbf16>
    %c0_1 = arith.constant 0 : index
    %c0_2 = arith.constant 0 : index
    %1 = vector.load %arg6[%c0_1, %c0_2] : memref<1x128xf32, #tpu.memory_space<vmem>>, vector<1x128xf32>
    %c0_3 = arith.constant 0 : index
    %c0_4 = arith.constant 0 : index
    %2 = vector.load %arg1[%c0_3, %c0_4] : memref<112x25xbf16, #tpu.memory_space<vmem>>, vector<112x25xbf16>
    %cst = arith.constant dense<0.000000e+00> : vector<112x128xf32>
    %3 = tpu.matmul %2, %0, %cst {dimension_numbers = #tpu.dot_dimension_numbers<[1], [0], [0], [1], [0, 0, 1, 1], [], []>} : vector<112x25xbf16>, vector<25x128xbf16>, vector<112x128xf32> -> vector<112x128xf32>
    %4 = vector.broadcast %1 : vector<1x128xf32> to vector<112x128xf32>
    %5 = arith.addf %3, %4 : vector<112x128xf32>
    %cst_5 = arith.constant 0.000000e+00 : f32
    %6 = vector.broadcast %cst_5 : f32 to vector<112x128xf32>
    %7 = arith.maximumf %5, %6 : vector<112x128xf32>
    %c0_6 = arith.constant 0 : index
    %c0_7 = arith.constant 0 : index
    %8 = vector.load %arg2[%c0_6, %c0_7] : memref<112x25xbf16, #tpu.memory_space<vmem>>, vector<112x25xbf16>
    %cst_8 = arith.constant dense<0.000000e+00> : vector<112x128xf32>
    %9 = tpu.matmul %8, %0, %cst_8 {dimension_numbers = #tpu.dot_dimension_numbers<[1], [0], [0], [1], [0, 0, 1, 1], [], []>} : vector<112x25xbf16>, vector<25x128xbf16>, vector<112x128xf32> -> vector<112x128xf32>
    %10 = vector.broadcast %1 : vector<1x128xf32> to vector<112x128xf32>
    %11 = arith.addf %9, %10 : vector<112x128xf32>
    %cst_9 = arith.constant 0.000000e+00 : f32
    %12 = vector.broadcast %cst_9 : f32 to vector<112x128xf32>
    %13 = arith.maximumf %11, %12 : vector<112x128xf32>
    %14 = arith.maximumf %7, %13 : vector<112x128xf32>
    %c0_10 = arith.constant 0 : index
    %c0_11 = arith.constant 0 : index
    %15 = vector.load %arg3[%c0_10, %c0_11] : memref<112x25xbf16, #tpu.memory_space<vmem>>, vector<112x25xbf16>
    %cst_12 = arith.constant dense<0.000000e+00> : vector<112x128xf32>
    %16 = tpu.matmul %15, %0, %cst_12 {dimension_numbers = #tpu.dot_dimension_numbers<[1], [0], [0], [1], [0, 0, 1, 1], [], []>} : vector<112x25xbf16>, vector<25x128xbf16>, vector<112x128xf32> -> vector<112x128xf32>
    %17 = vector.broadcast %1 : vector<1x128xf32> to vector<112x128xf32>
    %18 = arith.addf %16, %17 : vector<112x128xf32>
    %cst_13 = arith.constant 0.000000e+00 : f32
    %19 = vector.broadcast %cst_13 : f32 to vector<112x128xf32>
    %20 = arith.maximumf %18, %19 : vector<112x128xf32>
    %c0_14 = arith.constant 0 : index
    %c0_15 = arith.constant 0 : index
    %21 = vector.load %arg4[%c0_14, %c0_15] : memref<112x25xbf16, #tpu.memory_space<vmem>>, vector<112x25xbf16>
    %cst_16 = arith.constant dense<0.000000e+00> : vector<112x128xf32>
    %22 = tpu.matmul %21, %0, %cst_16 {dimension_numbers = #tpu.dot_dimension_numbers<[1], [0], [0], [1], [0, 0, 1, 1], [], []>} : vector<112x25xbf16>, vector<25x128xbf16>, vector<112x128xf32> -> vector<112x128xf32>
    %23 = vector.broadcast %1 : vector<1x128xf32> to vector<112x128xf32>
    %24 = arith.addf %22, %23 : vector<112x128xf32>
    %cst_17 = arith.constant 0.000000e+00 : f32
    %25 = vector.broadcast %cst_17 : f32 to vector<112x128xf32>
    %26 = arith.maximumf %24, %25 : vector<112x128xf32>
    %27 = arith.maximumf %20, %26 : vector<112x128xf32>
    %28 = arith.maximumf %14, %27 : vector<112x128xf32>
    %29 = arith.truncf %28 : vector<112x128xf32> to vector<112x128xbf16>
    %c0_18 = arith.constant 0 : index
    %c0_19 = arith.constant 0 : index
    %30 = vector.load %arg7[%c0_18, %c0_19] : memref<112x128xbf16, #tpu.memory_space<vmem>>, vector<112x128xbf16>
    tpu.vector_store %arg7[%c0_18, %c0_19], %29 {strides = array<i32>} : memref<112x128xbf16, #tpu.memory_space<vmem>>, vector<112x128xbf16>,
    return
  }
  func.func @transform_0(%arg0: i32) -> (i32, i32) {
    %c0_i32 = arith.constant 0 : i32
    %c0_i32_0 = arith.constant 0 : i32
    return %arg0, %c0_i32 : i32, i32
  }
  func.func @transform_1(%arg0: i32) -> (i32, i32) {
    %c0_i32 = arith.constant 0 : i32
    %c0_i32_0 = arith.constant 0 : i32
    return %arg0, %c0_i32 : i32, i32
  }
  func.func @transform_2(%arg0: i32) -> (i32, i32) {
    %c0_i32 = arith.constant 0 : i32
    %c0_i32_0 = arith.constant 0 : i32
    return %arg0, %c0_i32 : i32, i32
  }
  func.func @transform_3(%arg0: i32) -> (i32, i32) {
    %c0_i32 = arith.constant 0 : i32
    %c0_i32_0 = arith.constant 0 : i32
    return %arg0, %c0_i32 : i32, i32
  }
  func.func @transform_4(%arg0: i32) -> (i32, i32) {
    %c0_i32 = arith.constant 0 : i32
    %c0_i32_0 = arith.constant 0 : i32
    %c0_i32_1 = arith.constant 0 : i32
    return %c0_i32, %c0_i32_0 : i32, i32
  }
  func.func @transform_5(%arg0: i32) -> (i32, i32) {
    %c0_i32 = arith.constant 0 : i32
    %c0_i32_0 = arith.constant 0 : i32
    %c0_i32_1 = arith.constant 0 : i32
    return %c0_i32, %c0_i32_0 : i32, i32
  }
  func.func @transform_6(%arg0: i32) -> (i32, i32) {
    %c0_i32 = arith.constant 0 : i32
    %c0_i32_0 = arith.constant 0 : i32
    return %arg0, %c0_i32 : i32, i32
  }
}

module attributes {stable_mosaic.version = 11 : i64} {
  func.func @_conv_relu_pool_kernel(%arg0: i32, %arg1: memref<16x150xbf16, #tpu.memory_space<vmem>>, %arg2: memref<16x150xbf16, #tpu.memory_space<vmem>>, %arg3: memref<16x150xbf16, #tpu.memory_space<vmem>>, %arg4: memref<16x150xbf16, #tpu.memory_space<vmem>>, %arg5: memref<150x128xbf16, #tpu.memory_space<vmem>>, %arg6: memref<1x128xf32, #tpu.memory_space<vmem>>, %arg7: memref<16x128xbf16, #tpu.memory_space<vmem>>) attributes {dimension_semantics = [#tpu.dimension_semantics<parallel>], iteration_bounds = array<i64: 4>, scalar_prefetch = 0 : i64, scratch_operands = 0 : i64, tpu.core_type = #tpu.core_type<tc>, window_params = [{transform_indices = @transform_0, window_bounds = array<i64: 16, 150>}, {transform_indices = @transform_1, window_bounds = array<i64: 16, 150>}, {transform_indices = @transform_2, window_bounds = array<i64: 16, 150>}, {transform_indices = @transform_3, window_bounds = array<i64: 16, 150>}, {pipeline_mode = #tpu.pipeline_mode<synchronous>, transform_indices = @transform_4, window_bounds = array<i64: 150, 128>}, {pipeline_mode = #tpu.pipeline_mode<synchronous>, transform_indices = @transform_5, window_bounds = array<i64: 1, 128>}, {transform_indices = @transform_6, window_bounds = array<i64: 16, 128>}]} {
    %c0 = arith.constant 0 : index
    %c0_0 = arith.constant 0 : index
    %0 = vector.load %arg5[%c0, %c0_0] : memref<150x128xbf16, #tpu.memory_space<vmem>>, vector<150x128xbf16>
    %c0_1 = arith.constant 0 : index
    %c0_2 = arith.constant 0 : index
    %1 = vector.load %arg6[%c0_1, %c0_2] : memref<1x128xf32, #tpu.memory_space<vmem>>, vector<1x128xf32>
    %c0_3 = arith.constant 0 : index
    %c0_4 = arith.constant 0 : index
    %2 = vector.load %arg1[%c0_3, %c0_4] : memref<16x150xbf16, #tpu.memory_space<vmem>>, vector<16x150xbf16>
    %cst = arith.constant dense<0.000000e+00> : vector<16x128xf32>
    %3 = tpu.matmul %2, %0, %cst {dimension_numbers = #tpu.dot_dimension_numbers<[1], [0], [0], [1], [0, 0, 1, 1], [], []>} : vector<16x150xbf16>, vector<150x128xbf16>, vector<16x128xf32> -> vector<16x128xf32>
    %4 = vector.broadcast %1 : vector<1x128xf32> to vector<16x128xf32>
    %5 = arith.addf %3, %4 : vector<16x128xf32>
    %cst_5 = arith.constant 0.000000e+00 : f32
    %6 = vector.broadcast %cst_5 : f32 to vector<16x128xf32>
    %7 = arith.maximumf %5, %6 : vector<16x128xf32>
    %c0_6 = arith.constant 0 : index
    %c0_7 = arith.constant 0 : index
    %8 = vector.load %arg2[%c0_6, %c0_7] : memref<16x150xbf16, #tpu.memory_space<vmem>>, vector<16x150xbf16>
    %cst_8 = arith.constant dense<0.000000e+00> : vector<16x128xf32>
    %9 = tpu.matmul %8, %0, %cst_8 {dimension_numbers = #tpu.dot_dimension_numbers<[1], [0], [0], [1], [0, 0, 1, 1], [], []>} : vector<16x150xbf16>, vector<150x128xbf16>, vector<16x128xf32> -> vector<16x128xf32>
    %10 = vector.broadcast %1 : vector<1x128xf32> to vector<16x128xf32>
    %11 = arith.addf %9, %10 : vector<16x128xf32>
    %cst_9 = arith.constant 0.000000e+00 : f32
    %12 = vector.broadcast %cst_9 : f32 to vector<16x128xf32>
    %13 = arith.maximumf %11, %12 : vector<16x128xf32>
    %14 = arith.maximumf %7, %13 : vector<16x128xf32>
    %c0_10 = arith.constant 0 : index
    %c0_11 = arith.constant 0 : index
    %15 = vector.load %arg3[%c0_10, %c0_11] : memref<16x150xbf16, #tpu.memory_space<vmem>>, vector<16x150xbf16>
    %cst_12 = arith.constant dense<0.000000e+00> : vector<16x128xf32>
    %16 = tpu.matmul %15, %0, %cst_12 {dimension_numbers = #tpu.dot_dimension_numbers<[1], [0], [0], [1], [0, 0, 1, 1], [], []>} : vector<16x150xbf16>, vector<150x128xbf16>, vector<16x128xf32> -> vector<16x128xf32>
    %17 = vector.broadcast %1 : vector<1x128xf32> to vector<16x128xf32>
    %18 = arith.addf %16, %17 : vector<16x128xf32>
    %cst_13 = arith.constant 0.000000e+00 : f32
    %19 = vector.broadcast %cst_13 : f32 to vector<16x128xf32>
    %20 = arith.maximumf %18, %19 : vector<16x128xf32>
    %c0_14 = arith.constant 0 : index
    %c0_15 = arith.constant 0 : index
    %21 = vector.load %arg4[%c0_14, %c0_15] : memref<16x150xbf16, #tpu.memory_space<vmem>>, vector<16x150xbf16>
    %cst_16 = arith.constant dense<0.000000e+00> : vector<16x128xf32>
    %22 = tpu.matmul %21, %0, %cst_16 {dimension_numbers = #tpu.dot_dimension_numbers<[1], [0], [0], [1], [0, 0, 1, 1], [], []>} : vector<16x150xbf16>, vector<150x128xbf16>, vector<16x128xf32> -> vector<16x128xf32>
    %23 = vector.broadcast %1 : vector<1x128xf32> to vector<16x128xf32>
    %24 = arith.addf %22, %23 : vector<16x128xf32>
    %cst_17 = arith.constant 0.000000e+00 : f32
    %25 = vector.broadcast %cst_17 : f32 to vector<16x128xf32>
    %26 = arith.maximumf %24, %25 : vector<16x128xf32>
    %27 = arith.maximumf %20, %26 : vector<16x128xf32>
    %28 = arith.maximumf %14, %27 : vector<16x128xf32>
    %29 = arith.truncf %28 : vector<16x128xf32> to vector<16x128xbf16>
    %c0_18 = arith.constant 0 : index
    %c0_19 = arith.constant 0 : index
    %30 = vector.load %arg7[%c0_18, %c0_19] : memref<16x128xbf16, #tpu.memory_space<vmem>>, vector<16x128xbf16>
    tpu.vector_store %arg7[%c0_18, %c0_19], %29 {strides = array<i32>} : memref<16x128xbf16, #tpu.memory_space<vmem>>, vector<16x128xbf16>,
    return
  }
  func.func @transform_0(%arg0: i32) -> (i32, i32) {
    %c0_i32 = arith.constant 0 : i32
    %c0_i32_0 = arith.constant 0 : i32
    return %arg0, %c0_i32 : i32, i32
  }
  func.func @transform_1(%arg0: i32) -> (i32, i32) {
    %c0_i32 = arith.constant 0 : i32
    %c0_i32_0 = arith.constant 0 : i32
    return %arg0, %c0_i32 : i32, i32
  }
  func.func @transform_2(%arg0: i32) -> (i32, i32) {
    %c0_i32 = arith.constant 0 : i32
    %c0_i32_0 = arith.constant 0 : i32
    return %arg0, %c0_i32 : i32, i32
  }
  func.func @transform_3(%arg0: i32) -> (i32, i32) {
    %c0_i32 = arith.constant 0 : i32
    %c0_i32_0 = arith.constant 0 : i32
    return %arg0, %c0_i32 : i32, i32
  }
  func.func @transform_4(%arg0: i32) -> (i32, i32) {
    %c0_i32 = arith.constant 0 : i32
    %c0_i32_0 = arith.constant 0 : i32
    %c0_i32_1 = arith.constant 0 : i32
    return %c0_i32, %c0_i32_0 : i32, i32
  }
  func.func @transform_5(%arg0: i32) -> (i32, i32) {
    %c0_i32 = arith.constant 0 : i32
    %c0_i32_0 = arith.constant 0 : i32
    %c0_i32_1 = arith.constant 0 : i32
    return %c0_i32, %c0_i32_0 : i32, i32
  }
  func.func @transform_6(%arg0: i32) -> (i32, i32) {
    %c0_i32 = arith.constant 0 : i32
    %c0_i32_0 = arith.constant 0 : i32
    return %arg0, %c0_i32 : i32, i32
  }
}

module attributes {stable_mosaic.version = 11 : i64} {
  func.func @_fc_fused_kernel(%arg0: i32, %arg1: memref<16x400xbf16, #tpu.memory_space<vmem>>, %arg2: memref<400x128xbf16, #tpu.memory_space<vmem>>, %arg3: memref<1x128xf32, #tpu.memory_space<vmem>>, %arg4: memref<128x128xbf16, #tpu.memory_space<vmem>>, %arg5: memref<1x128xf32, #tpu.memory_space<vmem>>, %arg6: memref<128x128xbf16, #tpu.memory_space<vmem>>, %arg7: memref<1x128xf32, #tpu.memory_space<vmem>>, %arg8: memref<16x128xf32, #tpu.memory_space<vmem>>) attributes {dimension_semantics = [#tpu.dimension_semantics<parallel>], iteration_bounds = array<i64: 1>, scalar_prefetch = 0 : i64, scratch_operands = 0 : i64, tpu.core_type = #tpu.core_type<tc>, window_params = [{transform_indices = @transform_0, window_bounds = array<i64: 16, 400>}, {pipeline_mode = #tpu.pipeline_mode<synchronous>, transform_indices = @transform_1, window_bounds = array<i64: 400, 128>}, {pipeline_mode = #tpu.pipeline_mode<synchronous>, transform_indices = @transform_2, window_bounds = array<i64: 1, 128>}, {pipeline_mode = #tpu.pipeline_mode<synchronous>, transform_indices = @transform_3, window_bounds = array<i64: 128, 128>}, {pipeline_mode = #tpu.pipeline_mode<synchronous>, transform_indices = @transform_4, window_bounds = array<i64: 1, 128>}, {pipeline_mode = #tpu.pipeline_mode<synchronous>, transform_indices = @transform_5, window_bounds = array<i64: 128, 128>}, {pipeline_mode = #tpu.pipeline_mode<synchronous>, transform_indices = @transform_6, window_bounds = array<i64: 1, 128>}, {transform_indices = @transform_7, window_bounds = array<i64: 16, 128>}]} {
    %c0 = arith.constant 0 : index
    %c0_0 = arith.constant 0 : index
    %0 = vector.load %arg1[%c0, %c0_0] : memref<16x400xbf16, #tpu.memory_space<vmem>>, vector<16x400xbf16>
    %c0_1 = arith.constant 0 : index
    %c0_2 = arith.constant 0 : index
    %1 = vector.load %arg2[%c0_1, %c0_2] : memref<400x128xbf16, #tpu.memory_space<vmem>>, vector<400x128xbf16>
    %cst = arith.constant dense<0.000000e+00> : vector<16x128xf32>
    %2 = tpu.matmul %0, %1, %cst {dimension_numbers = #tpu.dot_dimension_numbers<[1], [0], [0], [1], [0, 0, 1, 1], [], []>} : vector<16x400xbf16>, vector<400x128xbf16>, vector<16x128xf32> -> vector<16x128xf32>
    %c0_3 = arith.constant 0 : index
    %c0_4 = arith.constant 0 : index
    %3 = vector.load %arg3[%c0_3, %c0_4] : memref<1x128xf32, #tpu.memory_space<vmem>>, vector<1x128xf32>
    %4 = vector.broadcast %3 : vector<1x128xf32> to vector<16x128xf32>
    %5 = arith.addf %2, %4 : vector<16x128xf32>
    %cst_5 = arith.constant 0.000000e+00 : f32
    %6 = vector.broadcast %cst_5 : f32 to vector<16x128xf32>
    %7 = arith.maximumf %5, %6 : vector<16x128xf32>
    %8 = arith.truncf %7 : vector<16x128xf32> to vector<16x128xbf16>
    %c0_6 = arith.constant 0 : index
    %c0_7 = arith.constant 0 : index
    %9 = vector.load %arg4[%c0_6, %c0_7] : memref<128x128xbf16, #tpu.memory_space<vmem>>, vector<128x128xbf16>
    %cst_8 = arith.constant dense<0.000000e+00> : vector<16x128xf32>
    %10 = tpu.matmul %8, %9, %cst_8 {dimension_numbers = #tpu.dot_dimension_numbers<[1], [0], [0], [1], [0, 0, 1, 1], [], []>} : vector<16x128xbf16>, vector<128x128xbf16>, vector<16x128xf32> -> vector<16x128xf32>
    %c0_9 = arith.constant 0 : index
    %c0_10 = arith.constant 0 : index
    %11 = vector.load %arg5[%c0_9, %c0_10] : memref<1x128xf32, #tpu.memory_space<vmem>>, vector<1x128xf32>
    %12 = vector.broadcast %11 : vector<1x128xf32> to vector<16x128xf32>
    %13 = arith.addf %10, %12 : vector<16x128xf32>
    %cst_11 = arith.constant 0.000000e+00 : f32
    %14 = vector.broadcast %cst_11 : f32 to vector<16x128xf32>
    %15 = arith.maximumf %13, %14 : vector<16x128xf32>
    %16 = arith.truncf %15 : vector<16x128xf32> to vector<16x128xbf16>
    %c0_12 = arith.constant 0 : index
    %c0_13 = arith.constant 0 : index
    %17 = vector.load %arg6[%c0_12, %c0_13] : memref<128x128xbf16, #tpu.memory_space<vmem>>, vector<128x128xbf16>
    %cst_14 = arith.constant dense<0.000000e+00> : vector<16x128xf32>
    %18 = tpu.matmul %16, %17, %cst_14 {dimension_numbers = #tpu.dot_dimension_numbers<[1], [0], [0], [1], [0, 0, 1, 1], [], []>} : vector<16x128xbf16>, vector<128x128xbf16>, vector<16x128xf32> -> vector<16x128xf32>
    %c0_15 = arith.constant 0 : index
    %c0_16 = arith.constant 0 : index
    %19 = vector.load %arg7[%c0_15, %c0_16] : memref<1x128xf32, #tpu.memory_space<vmem>>, vector<1x128xf32>
    %20 = vector.broadcast %19 : vector<1x128xf32> to vector<16x128xf32>
    %21 = arith.addf %18, %20 : vector<16x128xf32>
    %c0_17 = arith.constant 0 : index
    %c0_18 = arith.constant 0 : index
    %22 = vector.load %arg8[%c0_17, %c0_18] : memref<16x128xf32, #tpu.memory_space<vmem>>, vector<16x128xf32>
    tpu.vector_store %arg8[%c0_17, %c0_18], %21 {strides = array<i32>} : memref<16x128xf32, #tpu.memory_space<vmem>>, vector<16x128xf32>,
    return
  }
  func.func @transform_0(%arg0: i32) -> (i32, i32) {
    %c0_i32 = arith.constant 0 : i32
    %c0_i32_0 = arith.constant 0 : i32
    return %arg0, %c0_i32 : i32, i32
  }
  func.func @transform_1(%arg0: i32) -> (i32, i32) {
    %c0_i32 = arith.constant 0 : i32
    %c0_i32_0 = arith.constant 0 : i32
    %c0_i32_1 = arith.constant 0 : i32
    return %c0_i32, %c0_i32_0 : i32, i32
  }
  func.func @transform_2(%arg0: i32) -> (i32, i32) {
    %c0_i32 = arith.constant 0 : i32
    %c0_i32_0 = arith.constant 0 : i32
    %c0_i32_1 = arith.constant 0 : i32
    return %c0_i32, %c0_i32_0 : i32, i32
  }
  func.func @transform_3(%arg0: i32) -> (i32, i32) {
    %c0_i32 = arith.constant 0 : i32
    %c0_i32_0 = arith.constant 0 : i32
    %c0_i32_1 = arith.constant 0 : i32
    return %c0_i32, %c0_i32_0 : i32, i32
  }
  func.func @transform_4(%arg0: i32) -> (i32, i32) {
    %c0_i32 = arith.constant 0 : i32
    %c0_i32_0 = arith.constant 0 : i32
    %c0_i32_1 = arith.constant 0 : i32
    return %c0_i32, %c0_i32_0 : i32, i32
  }
  func.func @transform_5(%arg0: i32) -> (i32, i32) {
    %c0_i32 = arith.constant 0 : i32
    %c0_i32_0 = arith.constant 0 : i32
    %c0_i32_1 = arith.constant 0 : i32
    return %c0_i32, %c0_i32_0 : i32, i32
  }
  func.func @transform_6(%arg0: i32) -> (i32, i32) {
    %c0_i32 = arith.constant 0 : i32
    %c0_i32_0 = arith.constant 0 : i32
    %c0_i32_1 = arith.constant 0 : i32
    return %c0_i32, %c0_i32_0 : i32, i32
  }
  func.func @transform_7(%arg0: i32) -> (i32, i32) {
    %c0_i32 = arith.constant 0 : i32
    %c0_i32_0 = arith.constant 0 : i32
    return %arg0, %c0_i32 : i32, i32
  }
}

</mosaic_0001>

<bundles_post_ra>
// kernel: dnn_forward.3
= control target key start
LH: loop header
LB: loop body
LE: loop exit
PB: predicated region body
PF: predicated region fallthrough
CT: control target
= control target key end

     0   :  { %s1308_s21 = smov 0   ;;  %s1484_s0 = inlined_call_operand.vmem [shape: bf16[448,25], index: 0, kind: input, shape index: {}]   ;;  %s1485_s1 = inlined_call_operand.vmem [shape: bf16[448,25], index: 1, kind: input, shape index: {}]   ;;  %s1486_s2 = inlined_call_operand.vmem [shape: bf16[448,25], index: 2, kind: input, shape index: {}]   ;;  %s1487_s3 = inlined_call_operand.vmem [shape: bf16[448,25], index: 3, kind: input, shape index: {}]   ;;  %s1488_s4 = inlined_call_operand.vmem [shape: bf16[25,128], index: 4, kind: input, shape index: {}]   ;;  %s1489_s5 = inlined_call_operand.vmem [shape: f32[1,128], index: 5, kind: input, shape index: {}]   ;;  %s1490_s6 = inlined_call_operand.vmem [shape: bf16[448,128], index: 6, kind: output, shape index: {}]  }
   0x1 LB: > { %s1023_s22 = sadd.s32 4294967295, %s1270_s21   ;;  %p1027_p0 = scmp.ge.s32.totalorder %s1270_s21, 1  ;;  %s1270_s21 = sphi %s1308_s21, %s16_s21  }
   0x2   : > { %p246_p1 = scmp.lt.s32.totalorder %s1270_s21, 5 }
   0x4   : > { %p247_p2 = pnand %p1027_p0, %p246_p1 }
   0x5   : > { %s291_s27 = smul.u32 (!%p247_p2), 14, %s1023_s22 }
   0x6   : > { %250 = sbr.rel (%p247_p2) target bundleno = 272 (0x110), region = 44 }
   0x7   : > { %p292_p3 = scmp.lt.s32.totalorder (!%p247_p2), %s291_s27, 55 }
   0xb   : > { %v1067_v0 = vld [vmem:[%s1488_s4 + $0x8] sm:$0xf]  ;;  %v1184_v1 = vld [vmem:[%s1488_s4 + $0x8] sm:$0x10]  ;;  %vm412_vm0 = vcmask 1043456   ;;  %vm413_vm1 = vcmask 1044480  }
   0xc   : > { %v1068_v2 = vor.u32 %v1184_v1, %v1067_v0  ;;  %v1272_v3 = vmov 65535   ;;  %s1492_s27 = smov (!%p292_p3, %s291_s27), 55  ;;  %v1183_v7 = vld [vmem:[%s1488_s4] sm:$0xff]  ;;  %vm390_vm2 = vcmask 203776  }
   0xd   : > { %v414_v4 = vsel %vm412_vm0, 4294967295, %v1272_v3  ;;  %s1325_s30 = sshll.u32 %s1492_s27, 2  ;;  %v1410_v38 = vld [vmem:[%s1489_s5] ss:$0 sm:$0xff] }
   0xe   : > { %v415_v5 = vsel %vm413_vm1, %v414_v4, 0  ;;  %s1331_s9 = scalar_lea.vmem %s1484_s0, %s1325_s30  ;;  %s1337_s12 = scalar_lea.vmem %s1485_s1, %s1325_s30 }
   0xf   : > { %v417_v6 = vand.u32 %v1068_v2, %v415_v5  ;;  %v1185_v8 = vld [vmem:[%s1331_s9] sm:$0xff]  ;;  %s1345_s15 = scalar_lea.vmem %s1486_s2, %s1325_s30  ;;  %s1351_s18 = scalar_lea.vmem %s1487_s3, %s1325_s30  ;;  %v1186_v12 = vld [vmem:[%s1331_s9 + $0x8] sm:$0xff]  ;;  %v1187_v16 = vld [vmem:[%s1331_s9 + $0x10] sm:$0xff] }
  0x10   : > { %v1192_v9 = vld [vmem:[%s1337_s12] sm:$0xff]  ;;  %v1193_v13 = vld [vmem:[%s1337_s12 + $0x8] sm:$0xff]  ;;  %v1194_v17 = vld [vmem:[%s1337_s12 + $0x10] sm:$0xff]  ;;  %s1424_s24 = scalar_lea.vmem %s1490_s6, %s1325_s30 }
  0x11   : > { %425 = vmatpush.bf16.msra.mxu0 %v417_v6  ;;  %553 = vmatpush.bf16.msra.mxu1 %v417_v6  ;;  %v1199_v10 = vld [vmem:[%s1345_s15] sm:$0xff]  ;;  %v1200_v14 = vld [vmem:[%s1345_s15 + $0x8] sm:$0xff]  ;;  %v1201_v18 = vld [vmem:[%s1345_s15 + $0x10] sm:$0xff] }
  0x12   : > { %695 = vmatpush.bf16.msra.mxu2 %v417_v6  ;;  %823 = vmatpush.bf16.msra.mxu3 %v417_v6  ;;  %v1206_v11 = vld [vmem:[%s1351_s18] sm:$0xff]  ;;  %v1207_v15 = vld [vmem:[%s1351_s18 + $0x8] sm:$0xff]  ;;  %v1208_v19 = vld [vmem:[%s1351_s18 + $0x10] sm:$0xff] }
  0x13   : > { %v1188_v20 = vld [vmem:[%s1331_s9 + $0x18] sm:$0xff]  ;;  %v1189_v24 = vld [vmem:[%s1331_s9 + $0x20] sm:$0xff]  ;;  %v1190_v28 = vld [vmem:[%s1331_s9 + $0x28] sm:$0xff] }
  0x14   : > { %v1195_v21 = vld [vmem:[%s1337_s12 + $0x18] sm:$0xff]  ;;  %v1196_v25 = vld [vmem:[%s1337_s12 + $0x20] sm:$0xff]  ;;  %v1197_v29 = vld [vmem:[%s1337_s12 + $0x28] sm:$0xff] }
  0x15   : > { %426 = vmatpush.bf16.msra.mxu0 %v1183_v7  ;;  %554 = vmatpush.bf16.msra.mxu1 %v1183_v7  ;;  %v1202_v22 = vld [vmem:[%s1345_s15 + $0x18] sm:$0xff]  ;;  %v1203_v26 = vld [vmem:[%s1345_s15 + $0x20] sm:$0xff]  ;;  %v1204_v30 = vld [vmem:[%s1345_s15 + $0x28] sm:$0xff] }
  0x16   : > { %696 = vmatpush.bf16.msra.mxu2 %v1183_v7  ;;  %824 = vmatpush.bf16.msra.mxu3 %v1183_v7  ;;  %v1209_v23 = vld [vmem:[%s1351_s18 + $0x18] sm:$0xff]  ;;  %v1210_v27 = vld [vmem:[%s1351_s18 + $0x20] sm:$0xff]  ;;  %v1211_v31 = vld [vmem:[%s1351_s18 + $0x28] sm:$0xff] }
  0x17   : > { %v1191_v32 = vld [vmem:[%s1331_s9 + $0x30] sm:$0xff] }
  0x18   : > { %1069 = vmatmul.msk.bf16.vlgmr.msra.gmra.mxu0 %vm390_vm2, %v1185_v8  ;;  %1104 = vmatmul.msk.bf16.vlgmr.msra.gmra.mxu1 %vm390_vm2, %v1192_v9  ;;  %v1198_v33 = vld [vmem:[%s1337_s12 + $0x30] sm:$0xff] }
  0x19   : > { %1139 = vmatmul.msk.bf16.vlgmr.msra.gmra.mxu2 %vm390_vm2, %v1199_v10  ;;  %1174 = vmatmul.msk.bf16.vlgmr.msra.gmra.mxu3 %vm390_vm2, %v1206_v11  ;;  %v1205_v34 = vld [vmem:[%s1345_s15 + $0x30] sm:$0xff] }
  0x1a   : > { %v1212_v35 = vld [vmem:[%s1351_s18 + $0x30] sm:$0xff] }
  0x28   : > { %1070 = vmatmul.msk.bf16.gmra.mxu0 %vm390_vm2, %v1186_v12  ;;  %1105 = vmatmul.msk.bf16.gmra.mxu1 %vm390_vm2, %v1193_v13 }
  0x29   : > { %1140 = vmatmul.msk.bf16.gmra.mxu2 %vm390_vm2, %v1200_v14  ;;  %1175 = vmatmul.msk.bf16.gmra.mxu3 %vm390_vm2, %v1207_v15 }
  0x38   : > { %1071 = vmatmul.msk.bf16.gmra.mxu0 %vm390_vm2, %v1187_v16  ;;  %1106 = vmatmul.msk.bf16.gmra.mxu1 %vm390_vm2, %v1194_v17 }
  0x39   : > { %1141 = vmatmul.msk.bf16.gmra.mxu2 %vm390_vm2, %v1201_v18  ;;  %1176 = vmatmul.msk.bf16.gmra.mxu3 %vm390_vm2, %v1208_v19 }
  0x48   : > { %1072 = vmatmul.msk.bf16.gmra.mxu0 %vm390_vm2, %v1188_v20  ;;  %1107 = vmatmul.msk.bf16.gmra.mxu1 %vm390_vm2, %v1195_v21 }
  0x49   : > { %1142 = vmatmul.msk.bf16.gmra.mxu2 %vm390_vm2, %v1202_v22  ;;  %1177 = vmatmul.msk.bf16.gmra.mxu3 %vm390_vm2, %v1209_v23 }
  0x58   : > { %1073 = vmatmul.msk.bf16.gmra.mxu0 %vm390_vm2, %v1189_v24  ;;  %1108 = vmatmul.msk.bf16.gmra.mxu1 %vm390_vm2, %v1196_v25 }
  0x59   : > { %1143 = vmatmul.msk.bf16.gmra.mxu2 %vm390_vm2, %v1203_v26  ;;  %1178 = vmatmul.msk.bf16.gmra.mxu3 %vm390_vm2, %v1210_v27 }
  0x68   : > { %1074 = vmatmul.msk.bf16.gmra.mxu0 %vm390_vm2, %v1190_v28  ;;  %1109 = vmatmul.msk.bf16.gmra.mxu1 %vm390_vm2, %v1197_v29 }
  0x69   : > { %1144 = vmatmul.msk.bf16.gmra.mxu2 %vm390_vm2, %v1204_v30  ;;  %1179 = vmatmul.msk.bf16.gmra.mxu3 %vm390_vm2, %v1211_v31 }
  0x78   : > { %1075 = vmatmul.msk.bf16.gmra.mxu0 %vm390_vm2, %v1191_v32  ;;  %1110 = vmatmul.msk.bf16.gmra.mxu1 %vm390_vm2, %v1198_v33 }
  0x79   : > { %1145 = vmatmul.msk.bf16.gmra.mxu2 %vm390_vm2, %v1205_v34  ;;  %1180 = vmatmul.msk.bf16.gmra.mxu3 %vm390_vm2, %v1212_v35 }
  0x95   : > { %v428_v36 = vpop.f32.mrf.mxu0  ;;  %v556_v37 = vpop.f32.mrf.mxu1 }
  0x96   : > { %v429_v43 = vadd.f32 %v1410_v38, %v428_v36  ;;  %v557_v44 = vadd.f32 %v1410_v38, %v556_v37 }
  0x98   : > { %v463_v49 = vmax.f32 %v429_v43, 0.0  ;;  %v591_v50 = vmax.f32 %v557_v44, 0.0 }
  0x9a   : > { %v605_v61 = vmax.f32 %v463_v49, %v591_v50 }
  0x9c   : > { %v698_v39 = vpop.f32.mrf.mxu2  ;;  %v826_v40 = vpop.f32.mrf.mxu3 }
  0x9d   : > { %v430_v41 = vpop.f32.mrf.mxu0  ;;  %v558_v42 = vpop.f32.mrf.mxu1  ;;  %v699_v45 = vadd.f32 %v1410_v38, %v698_v39  ;;  %v827_v46 = vadd.f32 %v1410_v38, %v826_v40 }
  0x9e   : > { %v431_v47 = vadd.f32 %v1410_v38, %v430_v41  ;;  %v559_v48 = vadd.f32 %v1410_v38, %v558_v42 }
  0x9f   : > { %v733_v51 = vmax.f32 %v699_v45, 0.0  ;;  %v861_v52 = vmax.f32 %v827_v46, 0.0 }
  0xa0   : > { %v464_v55 = vmax.f32 %v431_v47, 0.0  ;;  %v592_v56 = vmax.f32 %v559_v48, 0.0 }
  0xa1   : > { %v875_v62 = vmax.f32 %v733_v51, %v861_v52 }
  0xa2   : > { %v606_v1 = vmax.f32 %v464_v55, %v592_v56 }
  0xa3   : > { %v889_v3 = vmax.f32 %v605_v61, %v875_v62 }
  0xa4   : > { %v700_v53 = vpop.f32.mrf.mxu2  ;;  %v828_v54 = vpop.f32.mrf.mxu3 }
  0xa5   : > { %v701_v57 = vadd.f32 %v1410_v38, %v700_v53  ;;  %v829_v58 = vadd.f32 %v1410_v38, %v828_v54  ;;  %v433_v59 = vpop.f32.mrf.mxu0  ;;  %v561_v60 = vpop.f32.mrf.mxu1 }
  0xa6   : > { %v434_v10 = vadd.f32 %v1410_v38, %v433_v59  ;;  %v562_v11 = vadd.f32 %v1410_v38, %v561_v60 }
  0xa7   : > { %v734_v63 = vmax.f32 %v701_v57, 0.0  ;;  %v862_v0 = vmax.f32 %v829_v58, 0.0 }
  0xa8   : > { %v465_v16 = vmax.f32 %v434_v10, 0.0  ;;  %v593_v17 = vmax.f32 %v562_v11, 0.0 }
  0xa9   : > { %v876_v2 = vmax.f32 %v734_v63, %v862_v0 }
  0xaa   : > { %v607_v28 = vmax.f32 %v465_v16, %v593_v17 }
  0xab   : > { %v890_v4 = vmax.f32 %v606_v1, %v876_v2 }
  0xac   : > { %v703_v5 = vpop.f32.mrf.mxu2  ;;  %v831_v6 = vpop.f32.mrf.mxu3 }
  0xad   : > { %v1216_v7 = vpack.c.bf16 %v890_v4, %v889_v3  ;;  %v435_v8 = vpop.f32.mrf.mxu0  ;;  %v563_v9 = vpop.f32.mrf.mxu1  ;;  %v704_v12 = vadd.f32 %v1410_v38, %v703_v5  ;;  %v832_v13 = vadd.f32 %v1410_v38, %v831_v6 }
  0xae   : > { %v436_v14 = vadd.f32 %v1410_v38, %v435_v8  ;;  %v564_v15 = vadd.f32 %v1410_v38, %v563_v9 }
  0xaf   : > { %1217 = vst [vmem:[%s1424_s24] sm:$0xff] %v1216_v7   ;;  %v735_v18 = vmax.f32 %v704_v12, 0.0  ;;  %v863_v19 = vmax.f32 %v832_v13, 0.0 }
  0xb0   : > { %v466_v22 = vmax.f32 %v436_v14, 0.0  ;;  %v594_v23 = vmax.f32 %v564_v15, 0.0 }
  0xb1   : > { %v877_v29 = vmax.f32 %v735_v18, %v863_v19 }
  0xb2   : > { %v608_v32 = vmax.f32 %v466_v22, %v594_v23 }
  0xb3   : > { %v891_v34 = vmax.f32 %v607_v28, %v877_v29 }
  0xb4   : > { %v705_v20 = vpop.f32.mrf.mxu2  ;;  %v833_v21 = vpop.f32.mrf.mxu3 }
  0xb5   : > { %v706_v24 = vadd.f32 %v1410_v38, %v705_v20  ;;  %v834_v25 = vadd.f32 %v1410_v38, %v833_v21  ;;  %v438_v26 = vpop.f32.mrf.mxu0  ;;  %v566_v27 = vpop.f32.mrf.mxu1 }
  0xb6   : > { %v439_v42 = vadd.f32 %v1410_v38, %v438_v26  ;;  %v567_v43 = vadd.f32 %v1410_v38, %v566_v27 }
  0xb7   : > { %v736_v30 = vmax.f32 %v706_v24, 0.0  ;;  %v864_v31 = vmax.f32 %v834_v25, 0.0 }
  0xb8   : > { %v467_v48 = vmax.f32 %v439_v42, 0.0  ;;  %v595_v49 = vmax.f32 %v567_v43, 0.0 }
  0xb9   : > { %v878_v33 = vmax.f32 %v736_v30, %v864_v31 }
  0xba   : > { %v609_v60 = vmax.f32 %v467_v48, %v595_v49 }
  0xbb   : > { %v892_v35 = vmax.f32 %v608_v32, %v878_v33 }
  0xbc   : > { %v708_v36 = vpop.f32.mrf.mxu2  ;;  %v836_v37 = vpop.f32.mrf.mxu3 }
  0xbd   : > { %v1221_v39 = vpack.c.bf16 %v892_v35, %v891_v34  ;;  %v440_v40 = vpop.f32.mrf.mxu0  ;;  %v568_v41 = vpop.f32.mrf.mxu1  ;;  %v709_v44 = vadd.f32 %v1410_v38, %v708_v36  ;;  %v837_v45 = vadd.f32 %v1410_v38, %v836_v37 }
  0xbe   : > { %v441_v46 = vadd.f32 %v1410_v38, %v440_v40  ;;  %v569_v47 = vadd.f32 %v1410_v38, %v568_v41 }
  0xbf   : > { %1248 = vst [vmem:[%s1424_s24 + $0x8] sm:$0xff] %v1221_v39   ;;  %v737_v50 = vmax.f32 %v709_v44, 0.0  ;;  %v865_v51 = vmax.f32 %v837_v45, 0.0 }
  0xc0   : > { %v468_v54 = vmax.f32 %v441_v46, 0.0  ;;  %v596_v55 = vmax.f32 %v569_v47, 0.0 }
  0xc1   : > { %v879_v61 = vmax.f32 %v737_v50, %v865_v51 }
  0xc2   : > { %v610_v0 = vmax.f32 %v468_v54, %v596_v55 }
  0xc3   : > { %v893_v2 = vmax.f32 %v609_v60, %v879_v61 }
  0xc4   : > { %v710_v52 = vpop.f32.mrf.mxu2  ;;  %v838_v53 = vpop.f32.mrf.mxu3 }
  0xc5   : > { %v711_v56 = vadd.f32 %v1410_v38, %v710_v52  ;;  %v839_v57 = vadd.f32 %v1410_v38, %v838_v53  ;;  %v443_v58 = vpop.f32.mrf.mxu0  ;;  %v571_v59 = vpop.f32.mrf.mxu1 }
  0xc6   : > { %v444_v9 = vadd.f32 %v1410_v38, %v443_v58  ;;  %v572_v10 = vadd.f32 %v1410_v38, %v571_v59 }
  0xc7   : > { %v738_v62 = vmax.f32 %v711_v56, 0.0  ;;  %v866_v63 = vmax.f32 %v839_v57, 0.0 }
  0xc8   : > { %v469_v15 = vmax.f32 %v444_v9, 0.0  ;;  %v597_v16 = vmax.f32 %v572_v10, 0.0 }
  0xc9   : > { %v880_v1 = vmax.f32 %v738_v62, %v866_v63 }
  0xca   : > { %v611_v27 = vmax.f32 %v469_v15, %v597_v16 }
  0xcb   : > { %v894_v3 = vmax.f32 %v610_v0, %v880_v1 }
  0xcc   : > { %v713_v4 = vpop.f32.mrf.mxu2  ;;  %v841_v5 = vpop.f32.mrf.mxu3 }
  0xcd   : > { %v1226_v6 = vpack.c.bf16 %v894_v3, %v893_v2  ;;  %v445_v7 = vpop.f32.mrf.mxu0  ;;  %v573_v8 = vpop.f32.mrf.mxu1  ;;  %v714_v11 = vadd.f32 %v1410_v38, %v713_v4  ;;  %v842_v12 = vadd.f32 %v1410_v38, %v841_v5 }
  0xce   : > { %v446_v13 = vadd.f32 %v1410_v38, %v445_v7  ;;  %v574_v14 = vadd.f32 %v1410_v38, %v573_v8 }
  0xcf   : > { %1249 = vst [vmem:[%s1424_s24 + $0x10] sm:$0xff] %v1226_v6   ;;  %v739_v17 = vmax.f32 %v714_v11, 0.0  ;;  %v867_v18 = vmax.f32 %v842_v12, 0.0 }
  0xd0   : > { %v470_v21 = vmax.f32 %v446_v13, 0.0  ;;  %v598_v22 = vmax.f32 %v574_v14, 0.0 }
  0xd1   : > { %v881_v28 = vmax.f32 %v739_v17, %v867_v18 }
  0xd2   : > { %v612_v31 = vmax.f32 %v470_v21, %v598_v22 }
  0xd3   : > { %v895_v33 = vmax.f32 %v611_v27, %v881_v28 }
  0xd4   : > { %v715_v19 = vpop.f32.mrf.mxu2  ;;  %v843_v20 = vpop.f32.mrf.mxu3 }
  0xd5   : > { %v716_v23 = vadd.f32 %v1410_v38, %v715_v19  ;;  %v844_v24 = vadd.f32 %v1410_v38, %v843_v20  ;;  %v448_v25 = vpop.f32.mrf.mxu0  ;;  %v576_v26 = vpop.f32.mrf.mxu1 }
  0xd6   : > { %v449_v41 = vadd.f32 %v1410_v38, %v448_v25  ;;  %v577_v42 = vadd.f32 %v1410_v38, %v576_v26 }
  0xd7   : > { %v740_v29 = vmax.f32 %v716_v23, 0.0  ;;  %v868_v30 = vmax.f32 %v844_v24, 0.0 }
  0xd8   : > { %v471_v47 = vmax.f32 %v449_v41, 0.0  ;;  %v599_v48 = vmax.f32 %v577_v42, 0.0 }
  0xd9   : > { %v882_v32 = vmax.f32 %v740_v29, %v868_v30 }
  0xda   : > { %v613_v59 = vmax.f32 %v471_v47, %v599_v48 }
  0xdb   : > { %v896_v34 = vmax.f32 %v612_v31, %v882_v32 }
  0xdc   : > { %v718_v35 = vpop.f32.mrf.mxu2  ;;  %v846_v36 = vpop.f32.mrf.mxu3 }
  0xdd   : > { %v1231_v37 = vpack.c.bf16 %v896_v34, %v895_v33  ;;  %v450_v39 = vpop.f32.mrf.mxu0  ;;  %v578_v40 = vpop.f32.mrf.mxu1  ;;  %v719_v43 = vadd.f32 %v1410_v38, %v718_v35  ;;  %v847_v44 = vadd.f32 %v1410_v38, %v846_v36 }
  0xde   : > { %v451_v45 = vadd.f32 %v1410_v38, %v450_v39  ;;  %v579_v46 = vadd.f32 %v1410_v38, %v578_v40 }
  0xdf   : > { %1250 = vst [vmem:[%s1424_s24 + $0x18] sm:$0xff] %v1231_v37   ;;  %v741_v49 = vmax.f32 %v719_v43, 0.0  ;;  %v869_v50 = vmax.f32 %v847_v44, 0.0 }
  0xe0   : > { %v472_v53 = vmax.f32 %v451_v45, 0.0  ;;  %v600_v54 = vmax.f32 %v579_v46, 0.0 }
  0xe1   : > { %v883_v60 = vmax.f32 %v741_v49, %v869_v50 }
  0xe2   : > { %v614_v63 = vmax.f32 %v472_v53, %v600_v54 }
  0xe3   : > { %v897_v1 = vmax.f32 %v613_v59, %v883_v60 }
  0xe4   : > { %v720_v51 = vpop.f32.mrf.mxu2  ;;  %v848_v52 = vpop.f32.mrf.mxu3 }
  0xe5   : > { %v721_v55 = vadd.f32 %v1410_v38, %v720_v51  ;;  %v849_v56 = vadd.f32 %v1410_v38, %v848_v52  ;;  %v453_v57 = vpop.f32.mrf.mxu0  ;;  %v581_v58 = vpop.f32.mrf.mxu1 }
  0xe6   : > { %v454_v8 = vadd.f32 %v1410_v38, %v453_v57  ;;  %v582_v9 = vadd.f32 %v1410_v38, %v581_v58 }
  0xe7   : > { %v742_v61 = vmax.f32 %v721_v55, 0.0  ;;  %v870_v62 = vmax.f32 %v849_v56, 0.0 }
  0xe8   : > { %v473_v14 = vmax.f32 %v454_v8, 0.0  ;;  %v601_v15 = vmax.f32 %v582_v9, 0.0 }
  0xe9   : > { %v884_v0 = vmax.f32 %v742_v61, %v870_v62 }
  0xea   : > { %v615_v26 = vmax.f32 %v473_v14, %v601_v15 }
  0xeb   : > { %v898_v2 = vmax.f32 %v614_v63, %v884_v0 }
  0xec   : > { %v723_v3 = vpop.f32.mrf.mxu2  ;;  %v851_v4 = vpop.f32.mrf.mxu3 }
  0xed   : > { %v1236_v5 = vpack.c.bf16 %v898_v2, %v897_v1  ;;  %v455_v6 = vpop.f32.mrf.mxu0  ;;  %v583_v7 = vpop.f32.mrf.mxu1  ;;  %v724_v10 = vadd.f32 %v1410_v38, %v723_v3  ;;  %v852_v11 = vadd.f32 %v1410_v38, %v851_v4 }
  0xee   : > { %v456_v12 = vadd.f32 %v1410_v38, %v455_v6  ;;  %v584_v13 = vadd.f32 %v1410_v38, %v583_v7 }
  0xef   : > { %1251 = vst [vmem:[%s1424_s24 + $0x20] sm:$0xff] %v1236_v5   ;;  %v743_v16 = vmax.f32 %v724_v10, 0.0  ;;  %v871_v17 = vmax.f32 %v852_v11, 0.0 }
  0xf0   : > { %v474_v20 = vmax.f32 %v456_v12, 0.0  ;;  %v602_v21 = vmax.f32 %v584_v13, 0.0 }
  0xf1   : > { %v885_v27 = vmax.f32 %v743_v16, %v871_v17 }
  0xf2   : > { %v616_v30 = vmax.f32 %v474_v20, %v602_v21 }
  0xf3   : > { %v899_v32 = vmax.f32 %v615_v26, %v885_v27 }
  0xf4   : > { %v725_v18 = vpop.f32.mrf.mxu2  ;;  %v853_v19 = vpop.f32.mrf.mxu3 }
  0xf5   : > { %v726_v22 = vadd.f32 %v1410_v38, %v725_v18  ;;  %v854_v23 = vadd.f32 %v1410_v38, %v853_v19  ;;  %v458_v24 = vpop.f32.mrf.mxu0  ;;  %v586_v25 = vpop.f32.mrf.mxu1 }
  0xf6   : > { %v459_v40 = vadd.f32 %v1410_v38, %v458_v24  ;;  %v587_v41 = vadd.f32 %v1410_v38, %v586_v25 }
  0xf7   : > { %v744_v28 = vmax.f32 %v726_v22, 0.0  ;;  %v872_v29 = vmax.f32 %v854_v23, 0.0 }
  0xf8   : > { %v475_v46 = vmax.f32 %v459_v40, 0.0  ;;  %v603_v47 = vmax.f32 %v587_v41, 0.0 }
  0xf9   : > { %v886_v31 = vmax.f32 %v744_v28, %v872_v29 }
  0xfa   : > { %v617_v56 = vmax.f32 %v475_v46, %v603_v47 }
  0xfb   : > { %v900_v33 = vmax.f32 %v616_v30, %v886_v31 }
  0xfc   : > { %v728_v34 = vpop.f32.mrf.mxu2  ;;  %v856_v35 = vpop.f32.mrf.mxu3 }
  0xfd   : > { %v1241_v36 = vpack.c.bf16 %v900_v33, %v899_v32  ;;  %v460_v37 = vpop.f32.mrf.mxu0  ;;  %v588_v39 = vpop.f32.mrf.mxu1  ;;  %v729_v42 = vadd.f32 %v1410_v38, %v728_v34  ;;  %v857_v43 = vadd.f32 %v1410_v38, %v856_v35 }
  0xfe   : > { %v461_v44 = vadd.f32 %v1410_v38, %v460_v37  ;;  %v589_v45 = vadd.f32 %v1410_v38, %v588_v39 }
  0xff   : > { %1252 = vst [vmem:[%s1424_s24 + $0x28] sm:$0xff] %v1241_v36   ;;  %v745_v48 = vmax.f32 %v729_v42, 0.0  ;;  %v873_v49 = vmax.f32 %v857_v43, 0.0 }
 0x100   : > { %v476_v52 = vmax.f32 %v461_v44, 0.0  ;;  %v604_v53 = vmax.f32 %v589_v45, 0.0 }
 0x101   : > { %v887_v57 = vmax.f32 %v745_v48, %v873_v49 }
 0x102   : > { %v618_v60 = vmax.f32 %v476_v52, %v604_v53 }
 0x103   : > { %v901_v62 = vmax.f32 %v617_v56, %v887_v57 }
 0x104   : > { %v730_v50 = vpop.f32.mrf.mxu2  ;;  %v858_v51 = vpop.f32.mrf.mxu3 }
 0x105   : > { %v731_v54 = vadd.f32 %v1410_v38, %v730_v50  ;;  %v859_v55 = vadd.f32 %v1410_v38, %v858_v51 }
 0x107   : > { %v746_v58 = vmax.f32 %v731_v54, 0.0  ;;  %v874_v59 = vmax.f32 %v859_v55, 0.0 }
 0x109   : > { %v888_v61 = vmax.f32 %v746_v58, %v874_v59 }
 0x10b   : > { %v902_v63 = vmax.f32 %v618_v60, %v888_v61 }
 0x10d   : > { %v1246_v0 = vpack.c.bf16 %v902_v63, %v901_v62 }
 0x10f   : > { %1253 = vst [vmem:[%s1424_s24 + $0x30] sm:$0xff] %v1246_v0  }
 0x110 PF: > { %s16_s21 = sadd.s32 1, %s1270_s21  }
 0x111   : > { %p13_p4 = scmp.ge.s32.totalorder %s16_s21, 6  }
 0x113   :  { %15 = sbr.rel (!%p13_p4) target bundleno = 1 (0x1), region = 83 }

// kernel: dnn_forward.4
= control target key start
LH: loop header
LB: loop body
LE: loop exit
PB: predicated region body
PF: predicated region fallthrough
CT: control target
= control target key end

     0   :  { %s868_s21 = smov 0   ;;  %s965_s0 = inlined_call_operand.vmem [shape: bf16[64,150], index: 0, kind: input, shape index: {}]   ;;  %s966_s1 = inlined_call_operand.vmem [shape: bf16[64,150], index: 1, kind: input, shape index: {}]   ;;  %s967_s2 = inlined_call_operand.vmem [shape: bf16[64,150], index: 2, kind: input, shape index: {}]   ;;  %s968_s3 = inlined_call_operand.vmem [shape: bf16[64,150], index: 3, kind: input, shape index: {}]   ;;  %s969_s4 = inlined_call_operand.vmem [shape: bf16[150,128], index: 4, kind: input, shape index: {}]   ;;  %s970_s5 = inlined_call_operand.vmem [shape: f32[1,128], index: 5, kind: input, shape index: {}]   ;;  %s971_s6 = inlined_call_operand.vmem [shape: bf16[64,128], index: 6, kind: output, shape index: {}]  }
   0x1 LB: > { %s697_s22 = sadd.s32 4294967295, %s831_s21   ;;  %p701_p0 = scmp.ge.s32.totalorder %s831_s21, 1  ;;  %s831_s21 = sphi %s868_s21, %s16_s21  }
   0x2   : > { %p250_p1 = scmp.lt.s32.totalorder %s831_s21, 5 }
   0x4   : > { %p251_p2 = pnand %p701_p0, %p250_p1 }
   0x5   : > { %s702_s27 = sshll.u32 (!%p251_p2), %s697_s22, 1 }
   0x6   : > { %254 = sbr.rel (%p251_p2) target bundleno = 214 (0xd6), region = 44  ;;  %p300_p3 = scmp.lt.s32.totalorder (!%p251_p2), %s702_s27, 7 }
   0xb   : > { %v801_v0 = vld [vmem:[%s969_s4 + $0x38] sm:$0xff]  ;;  %v352_v1 = vld [vmem:[%s969_s4 + $0x48] sm:$0x7]  ;;  %vm429_vm0 = vcmask 1042432   ;;  %v800_v4 = vld [vmem:[%s969_s4 + $0x30] sm:$0xff]  ;;  %s973_s27 = smov (!%p300_p3, %s702_s27), 7 }
   0xc   : > { %v405_v2 = vunpack.c.l.b16 %v352_v1  ;;  %433 = vmatpush.bf16.msra.mxu0 %v801_v0  ;;  %477 = vmatpush.bf16.msra.mxu2 %v801_v0  ;;  %s888_s30 = sshll.u32 %s973_s27, 3  ;;  %v893_v6 = vld [vmem:[%s969_s4 + $0x40] sm:$0xff]  ;;  %v799_v7 = vld [vmem:[%s969_s4 + $0x28] sm:$0xff]  ;;  %vm425_vm1 = vcmask 179200   ;;  %v797_v15 = vld [vmem:[%s969_s4 + $0x18] sm:$0xff] }
   0xd   : > { %s902_s13 = scalar_lea.vmem %s967_s2, %s888_s30  ;;  %s908_s16 = scalar_lea.vmem %s965_s0, %s888_s30  ;;  %v798_v14 = vld [vmem:[%s969_s4 + $0x20] sm:$0xff]  ;;  %v796_v16 = vld [vmem:[%s969_s4 + $0x10] sm:$0xff]  ;;  %v795_v17 = vld [vmem:[%s969_s4 + $0x8] sm:$0xff] }
   0xe   : > { %v415_v3 = vpack.c.b16 %v405_v2, %v405_v2  ;;  %v807_v8 = vld [vmem:[%s902_s13 + $0x4] sm:$0xf]  ;;  %v774_v9 = vld [vmem:[%s902_s13 + $0x8] sm:$0xf0]  ;;  %s934_s29 = scalar_lea.vmem %s966_s1, %s888_s30  ;;  %v718_v19 = vld [vmem:[%s908_s16] sm:$0xf]  ;;  %s325_s11 = scalar_lea.vmem %s968_s3, %s888_s30 }
   0xf   : > { %v803_v10 = vld [vmem:[%s908_s16 + $0x4] sm:$0xf]  ;;  %v720_v11 = vld [vmem:[%s908_s16 + $0x8] sm:$0xf0]  ;;  %v777_v12 = vor.u32 %v807_v8, %v774_v9  ;;  %v804_v20 = vld [vmem:[%s908_s16 + $0x4] sm:$0xf0] }
  0x10   : > { %v431_v5 = vsel %vm429_vm0, %v415_v3, 0  ;;  %434 = vmatpush.bf16.msra.mxu0 %v800_v4  ;;  %478 = vmatpush.bf16.msra.mxu2 %v800_v4  ;;  %v723_v13 = vor.u32 %v803_v10, %v720_v11  ;;  %v794_v18 = vld [vmem:[%s969_s4] sm:$0xff]  ;;  %v806_v22 = vld [vmem:[%s934_s29 + $0x4] sm:$0xf0]  ;;  %v719_v23 = vor.u32 %v804_v20, %v718_v19  ;;  %v765_v32 = vld [vmem:[%s934_s29 + $0x8] sm:$0xf0] }
  0x11   : > { %453 = vmatpush.bf16.msra.mxu1 %v431_v5  ;;  %543 = vmatpush.bf16.msra.mxu3 %v431_v5  ;;  %v763_v21 = vld [vmem:[%s934_s29] sm:$0xf]  ;;  %v808_v26 = vld [vmem:[%s902_s13 + $0x4] sm:$0xf0]  ;;  %v805_v31 = vld [vmem:[%s934_s29 + $0x4] sm:$0xf] }
  0x12   : > { %v764_v24 = vor.u32 %v806_v22, %v763_v21  ;;  %v772_v25 = vld [vmem:[%s902_s13] sm:$0xf]  ;;  %v810_v28 = vld [vmem:[%s325_s11 + $0x4] sm:$0xf0]  ;;  %v809_v33 = vld [vmem:[%s325_s11 + $0x4] sm:$0xf]  ;;  %v768_v35 = vor.u32 %v805_v31, %v765_v32 }
  0x13   : > { %v781_v27 = vld [vmem:[%s325_s11] sm:$0xf]  ;;  %v773_v29 = vor.u32 %v808_v26, %v772_v25  ;;  %v783_v34 = vld [vmem:[%s325_s11 + $0x8] sm:$0xf0]  ;;  %s715_s13 = sshll.u32 %s973_s27, 2 }
  0x14   : > { %435 = vmatpush.bf16.msra.mxu0 %v799_v7  ;;  %479 = vmatpush.bf16.msra.mxu2 %v799_v7  ;;  %v782_v30 = vor.u32 %v810_v28, %v781_v27  ;;  %v786_v36 = vor.u32 %v809_v33, %v783_v34  ;;  %v824_v48 = vld [vmem:[%s970_s5] ss:$0 sm:$0xff]  ;;  %s331_s16 = scalar_lea.vmem %s971_s6, %s715_s13 }
  0x15   : > { %454 = vmatpush.bf16.msra.mxu1 %v893_v6  ;;  %544 = vmatpush.bf16.msra.mxu3 %v893_v6 }
  0x18   : > { %778 = vmatmul.msk.bf16.vlgmr.msra.gmra.mxu3 %vm425_vm1, %v777_v12  ;;  %760 = vmatmul.msk.bf16.vlgmr.msra.gmra.mxu1 %vm425_vm1, %v723_v13 }
  0x19   : > { %523 = vmatpush.bf16.msrb.mxu1 %v801_v0  ;;  %567 = vmatpush.bf16.msrb.mxu3 %v801_v0 }
  0x1a   : > { %436 = vmatpush.bf16.msra.mxu0 %v798_v14  ;;  %480 = vmatpush.bf16.msra.mxu2 %v798_v14 }
  0x1d   : > { %524 = vmatpush.bf16.msrb.mxu1 %v800_v4  ;;  %568 = vmatpush.bf16.msrb.mxu3 %v800_v4 }
  0x1e   : > { %437 = vmatpush.bf16.msra.mxu0 %v797_v15  ;;  %481 = vmatpush.bf16.msra.mxu2 %v797_v15 }
  0x21   : > { %525 = vmatpush.bf16.msrb.mxu1 %v799_v7  ;;  %569 = vmatpush.bf16.msrb.mxu3 %v799_v7 }
  0x22   : > { %438 = vmatpush.bf16.msra.mxu0 %v796_v16  ;;  %482 = vmatpush.bf16.msra.mxu2 %v796_v16 }
  0x25   : > { %526 = vmatpush.bf16.msrb.mxu1 %v798_v14  ;;  %570 = vmatpush.bf16.msrb.mxu3 %v798_v14 }
  0x26   : > { %439 = vmatpush.bf16.msra.mxu0 %v795_v17  ;;  %483 = vmatpush.bf16.msra.mxu2 %v795_v17 }
  0x29   : > { %527 = vmatpush.bf16.msrb.mxu1 %v797_v15  ;;  %571 = vmatpush.bf16.msrb.mxu3 %v797_v15 }
  0x2a   : > { %440 = vmatpush.bf16.msra.mxu0 %v794_v18  ;;  %484 = vmatpush.bf16.msra.mxu2 %v794_v18 }
  0x2d   : > { %528 = vmatpush.bf16.msrb.mxu1 %v796_v16  ;;  %572 = vmatpush.bf16.msrb.mxu3 %v796_v16 }
  0x2e   : > { %497 = vmatpush.bf16.msrb.mxu2 %v431_v5  ;;  %587 = vmatpush.bf16.msrb.mxu0 %v431_v5 }
  0x2f   : > { %441 = vmatmul.bf16.vlgmr.msra.gmra.mxu0 %v719_v23  ;;  %485 = vmatmul.bf16.vlgmr.msra.gmra.mxu2 %v764_v24 }
  0x31   : > { %529 = vmatpush.bf16.msrb.mxu1 %v795_v17  ;;  %573 = vmatpush.bf16.msrb.mxu3 %v795_v17 }
  0x32   : > { %498 = vmatpush.bf16.msrb.mxu2 %v893_v6  ;;  %588 = vmatpush.bf16.msrb.mxu0 %v893_v6 }
  0x35   : > { %530 = vmatpush.bf16.msrb.mxu1 %v794_v18  ;;  %574 = vmatpush.bf16.msrb.mxu3 %v794_v18 }
  0x38   : > { %531 = vmatmul.bf16.vlgmr.msrb.gmra.mxu1 %v773_v29  ;;  %575 = vmatmul.bf16.vlgmr.msrb.gmra.mxu3 %v782_v30 }
  0x3f   : > { %769 = vmatmul.msk.bf16.vlgmr.msrb.gmra.mxu2 %vm425_vm1, %v768_v35  ;;  %787 = vmatmul.msk.bf16.vlgmr.msrb.gmra.mxu0 %vm425_vm1, %v786_v36 }
  0x95   : > { %v456_v37 = vpop.f32.mrf.mxu1 }
  0x9b   : > { %v546_v38 = vpop.f32.mrf.mxu3 }
  0x9d   : > { %v458_v40 = vpop.f32.mrf.mxu1 }
  0xa3   : > { %v548_v42 = vpop.f32.mrf.mxu3 }
  0xac   : > { %v442_v39 = vpop.f32.mrf.mxu0 }
  0xad   : > { %v443_v51 = vadd.f32 %v824_v48, %v442_v39 }
  0xaf   : > { %v457_v61 = vadd.f32 %v456_v37, %v443_v51 }
  0xb1   : > { %v461_v6 = vmax.f32 %v457_v61, 0.0 }
  0xb2   : > { %v486_v41 = vpop.f32.mrf.mxu2 }
  0xb3   : > { %v487_v52 = vadd.f32 %v824_v48, %v486_v41 }
  0xb4   : > { %v444_v43 = vpop.f32.mrf.mxu0 }
  0xb5   : > { %v532_v44 = vpop.f32.mrf.mxu1  ;;  %v445_v55 = vadd.f32 %v824_v48, %v444_v43 }
  0xb6   : > { %v533_v58 = vadd.f32 %v824_v48, %v532_v44 }
  0xb7   : > { %v459_v0 = vadd.f32 %v458_v40, %v445_v55 }
  0xb8   : > { %v547_v1 = vadd.f32 %v546_v38, %v533_v58 }
  0xb9   : > { %v462_v10 = vmax.f32 %v459_v0, 0.0 }
  0xba   : > { %v488_v45 = vpop.f32.mrf.mxu2  ;;  %v551_v11 = vmax.f32 %v547_v1, 0.0 }
  0xbb   : > { %v576_v46 = vpop.f32.mrf.mxu3  ;;  %v489_v2 = vadd.f32 %v824_v48, %v488_v45 }
  0xbc   : > { %v590_v47 = vpop.f32.mrf.mxu0  ;;  %v577_v53 = vadd.f32 %v824_v48, %v576_v46 }
  0xbd   : > { %v534_v49 = vpop.f32.mrf.mxu1 }
  0xbe   : > { %v535_v59 = vadd.f32 %v824_v48, %v534_v49  ;;  %v591_v62 = vadd.f32 %v590_v47, %v577_v53 }
  0xc0   : > { %v549_v3 = vadd.f32 %v548_v42, %v535_v59  ;;  %v595_v7 = vmax.f32 %v591_v62, 0.0 }
  0xc2   : > { %v500_v50 = vpop.f32.mrf.mxu2  ;;  %v552_v12 = vmax.f32 %v549_v3, 0.0  ;;  %v597_v15 = vmax.f32 %v551_v11, %v595_v7 }
  0xc3   : > { %v578_v54 = vpop.f32.mrf.mxu3  ;;  %v501_v60 = vadd.f32 %v500_v50, %v487_v52 }
  0xc4   : > { %v579_v56 = vadd.f32 %v824_v48, %v578_v54  ;;  %v592_v57 = vpop.f32.mrf.mxu0 }
  0xc5   : > { %v505_v4 = vmax.f32 %v501_v60, 0.0 }
  0xc6   : > { %v593_v63 = vadd.f32 %v592_v57, %v579_v56 }
  0xc7   : > { %v507_v13 = vmax.f32 %v461_v6, %v505_v4 }
  0xc8   : > { %v596_v8 = vmax.f32 %v593_v63, 0.0 }
  0xc9   : > { %v599_v18 = vmax.f32 %v507_v13, %v597_v15 }
  0xca   : > { %v502_v5 = vpop.f32.mrf.mxu2  ;;  %v598_v16 = vmax.f32 %v552_v12, %v596_v8 }
  0xcb   : > { %v503_v9 = vadd.f32 %v502_v5, %v489_v2 }
  0xcd   : > { %v506_v14 = vmax.f32 %v503_v9, 0.0 }
  0xcf   : > { %v508_v17 = vmax.f32 %v462_v10, %v506_v14 }
  0xd1   : > { %v600_v19 = vmax.f32 %v508_v17, %v598_v16 }
  0xd3   : > { %v814_v20 = vpack.c.bf16 %v600_v19, %v599_v18 }
  0xd5   : > { %815 = vst [vmem:[%s331_s16] sm:$0xff] %v814_v20  }
  0xd6 PF: > { %s16_s21 = sadd.s32 1, %s831_s21  }
  0xd7   : > { %p13_p4 = scmp.ge.s32.totalorder %s16_s21, 6  }
  0xd9   :  { %15 = sbr.rel (!%p13_p4) target bundleno = 1 (0x1), region = 83 }

// kernel: dnn_forward.5
= control target key start
LH: loop header
LB: loop body
LE: loop exit
PB: predicated region body
PF: predicated region fallthrough
CT: control target
= control target key end

     0   :  { %vm254_vm0 = vcmask 130048   ;;  %s921_s1 = inlined_call_operand.vmem [shape: bf16[400,128], index: 1, kind: input, shape index: {}]   ;;  %s922_s0 = inlined_call_operand.vmem [shape: bf16[16,400], index: 0, kind: input, shape index: {}]   ;;  %s923_s3 = inlined_call_operand.vmem [shape: bf16[128,128], index: 3, kind: input, shape index: {}]   ;;  %s924_s2 = inlined_call_operand.vmem [shape: f32[1,128], index: 2, kind: input, shape index: {}]   ;;  %s925_s4 = inlined_call_operand.vmem [shape: f32[1,128], index: 4, kind: input, shape index: {}]   ;;  %s926_s5 = inlined_call_operand.vmem [shape: bf16[128,128], index: 5, kind: input, shape index: {}]   ;;  %s927_s6 = inlined_call_operand.vmem [shape: f32[1,128], index: 6, kind: input, shape index: {}]   ;;  %s928_s7 = inlined_call_operand.vmem [shape: f32[16,128], index: 7, kind: output, shape index: {}]  }
   0x1   :  { %v682_v0 = vld [vmem:[%s921_s1 + $0x38] sm:$0xff]  ;;  %v681_v3 = vld [vmem:[%s921_s1 + $0x30] sm:$0xff]  ;;  %v680_v6 = vld [vmem:[%s921_s1 + $0x28] sm:$0xff] }
   0x2   :  { %v690_v1 = vld [vmem:[%s921_s1 + $0x78] sm:$0xff]  ;;  %258 = vmatpush.bf16.msra.mxu0 %v682_v0  ;;  %v689_v4 = vld [vmem:[%s921_s1 + $0x70] sm:$0xff]  ;;  %v688_v7 = vld [vmem:[%s921_s1 + $0x68] sm:$0xff] }
   0x3   :  { %v698_v2 = vld [vmem:[%s921_s1 + $0xb8] sm:$0xff]  ;;  %272 = vmatpush.bf16.msra.mxu1 %v690_v1  ;;  %v697_v5 = vld [vmem:[%s921_s1 + $0xb0] sm:$0xff]  ;;  %v699_v8 = vld [vmem:[%s921_s1 + $0xc0] sm:$0xff] }
   0x4   :  { %286 = vmatpush.bf16.msra.mxu2 %v698_v2  ;;  %v696_v9 = vld [vmem:[%s921_s1 + $0xa8] sm:$0xff]  ;;  %v502_v11 = vld [vmem:[%s922_s0 + $0x18] sm:$0xf0]  ;;  %307 = vmatpush.bf16.msra.mxu3 %v699_v8  ;;  %v679_v13 = vld [vmem:[%s921_s1 + $0x20] sm:$0xff] }
   0x5   :  { %v672_v10 = vld [vmem:[%s922_s0 + $0xc] sm:$0xf]  ;;  %v687_v14 = vld [vmem:[%s921_s1 + $0x60] sm:$0xff]  ;;  %v707_v16 = vld [vmem:[%s923_s3 + $0x38] sm:$0xff] }
   0x6   :  { %259 = vmatpush.bf16.msra.mxu0 %v681_v3  ;;  %v505_v12 = vor.u32 %v672_v10, %v502_v11  ;;  %v695_v15 = vld [vmem:[%s921_s1 + $0xa0] sm:$0xff]  ;;  %v706_v17 = vld [vmem:[%s923_s3 + $0x30] sm:$0xff]  ;;  %v678_v18 = vld [vmem:[%s921_s1 + $0x18] sm:$0xff] }
   0x7   :  { %273 = vmatpush.bf16.msra.mxu1 %v689_v4  ;;  %v686_v19 = vld [vmem:[%s921_s1 + $0x58] sm:$0xff]  ;;  %v677_v21 = vld [vmem:[%s921_s1 + $0x10] sm:$0xff]  ;;  %v676_v24 = vld [vmem:[%s921_s1 + $0x8] sm:$0xff] }
   0x8   :  { %287 = vmatpush.bf16.msra.mxu2 %v697_v5  ;;  %606 = vmatmul.msk.bf16.vlgmr.msra.gmra.mxu3 %vm254_vm0, %v505_v12  ;;  %v694_v20 = vld [vmem:[%s921_s1 + $0x98] sm:$0xff]  ;;  %v685_v22 = vld [vmem:[%s921_s1 + $0x50] sm:$0xff]  ;;  %v684_v25 = vld [vmem:[%s921_s1 + $0x48] sm:$0xff] }
   0x9   :  { %385 = vmatpush.bf16.msrb.mxu3 %v707_v16  ;;  %v693_v23 = vld [vmem:[%s921_s1 + $0x90] sm:$0xff]  ;;  %v692_v26 = vld [vmem:[%s921_s1 + $0x88] sm:$0xff]  ;;  %v675_v27 = vld [vmem:[%s921_s1] sm:$0xff] }
   0xa   :  { %260 = vmatpush.bf16.msra.mxu0 %v680_v6  ;;  %v683_v28 = vld [vmem:[%s921_s1 + $0x40] sm:$0xff]  ;;  %v673_v30 = vld [vmem:[%s922_s0 + $0xc] sm:$0xf0]  ;;  %v494_v32 = vld [vmem:[%s922_s0 + $0x10] sm:$0xf0] }
   0xb   :  { %274 = vmatpush.bf16.msra.mxu1 %v688_v7  ;;  %v492_v29 = vld [vmem:[%s922_s0] sm:$0xf]  ;;  %v671_v31 = vld [vmem:[%s922_s0 + $0x4] sm:$0xf]  ;;  %v500_v34 = vld [vmem:[%s922_s0 + $0x8] sm:$0xf] }
   0xc   :  { %288 = vmatpush.bf16.msra.mxu2 %v696_v9  ;;  %v691_v33 = vld [vmem:[%s921_s1 + $0x80] sm:$0xff]  ;;  %v674_v35 = vld [vmem:[%s922_s0 + $0x14] sm:$0xf0]  ;;  %v493_v36 = vor.u32 %v673_v30, %v492_v29  ;;  %v497_v37 = vor.u32 %v671_v31, %v494_v32  ;;  %v705_v39 = vld [vmem:[%s923_s3 + $0x28] sm:$0xff] }
   0xd   :  { %386 = vmatpush.bf16.msrb.mxu3 %v706_v17  ;;  %v501_v38 = vor.u32 %v674_v35, %v500_v34  ;;  %v704_v40 = vld [vmem:[%s923_s3 + $0x20] sm:$0xff]  ;;  %v703_v41 = vld [vmem:[%s923_s3 + $0x18] sm:$0xff]  ;;  %v702_v42 = vld [vmem:[%s923_s3 + $0x10] sm:$0xff] }
   0xe   :  { %261 = vmatpush.bf16.msra.mxu0 %v679_v13  ;;  %v701_v43 = vld [vmem:[%s923_s3 + $0x8] sm:$0xff]  ;;  %v700_v44 = vld [vmem:[%s923_s3] sm:$0xff]  ;;  %v715_v45 = vld [vmem:[%s926_s5 + $0x38] sm:$0xff] }
   0xf   :  { %275 = vmatpush.bf16.msra.mxu1 %v687_v14  ;;  %v714_v46 = vld [vmem:[%s926_s5 + $0x30] sm:$0xff]  ;;  %v713_v47 = vld [vmem:[%s926_s5 + $0x28] sm:$0xff]  ;;  %v716_v48 = vld [vmem:[%s924_s2] ss:$0 sm:$0xff] }
  0x10   :  { %289 = vmatpush.bf16.msra.mxu2 %v695_v15  ;;  %v712_v50 = vld [vmem:[%s926_s5 + $0x20] sm:$0xff]  ;;  %v711_v5 = vld [vmem:[%s926_s5 + $0x18] sm:$0xff]  ;;  %v710_v6 = vld [vmem:[%s926_s5 + $0x10] sm:$0xff] }
  0x11   :  { %387 = vmatpush.bf16.msrb.mxu3 %v705_v39  ;;  %v709_v7 = vld [vmem:[%s926_s5 + $0x8] sm:$0xff]  ;;  %v708_v8 = vld [vmem:[%s926_s5] sm:$0xff] }
  0x12   :  { %262 = vmatpush.bf16.msra.mxu0 %v678_v18  ;;  %v717_v10 = vld [vmem:[%s925_s4] ss:$0 sm:$0xff] }
  0x13   :  { %276 = vmatpush.bf16.msra.mxu1 %v686_v19  ;;  %v718_v17 = vld [vmem:[%s927_s6] ss:$0 sm:$0xff] }
  0x14   :  { %290 = vmatpush.bf16.msra.mxu2 %v694_v20 }
  0x15   :  { %388 = vmatpush.bf16.msrb.mxu3 %v704_v40 }
  0x16   :  { %263 = vmatpush.bf16.msra.mxu0 %v677_v21 }
  0x17   :  { %277 = vmatpush.bf16.msra.mxu1 %v685_v22 }
  0x18   :  { %291 = vmatpush.bf16.msra.mxu2 %v693_v23 }
  0x19   :  { %389 = vmatpush.bf16.msrb.mxu3 %v703_v41 }
  0x1a   :  { %264 = vmatpush.bf16.msra.mxu0 %v676_v24 }
  0x1b   :  { %278 = vmatpush.bf16.msra.mxu1 %v684_v25 }
  0x1c   :  { %292 = vmatpush.bf16.msra.mxu2 %v692_v26 }
  0x1d   :  { %390 = vmatpush.bf16.msrb.mxu3 %v702_v42 }
  0x1e   :  { %265 = vmatpush.bf16.msra.mxu0 %v675_v27 }
  0x1f   :  { %279 = vmatpush.bf16.msra.mxu1 %v683_v28 }
  0x20   :  { %293 = vmatpush.bf16.msra.mxu2 %v691_v33 }
  0x21   :  { %266 = vmatmul.bf16.vlgmr.msra.gmra.mxu0 %v493_v36  ;;  %391 = vmatpush.bf16.msrb.mxu3 %v701_v43 }
  0x22   :  { %280 = vmatmul.bf16.vlgmr.msra.gmra.mxu1 %v497_v37  ;;  %470 = vmatpush.bf16.msrb.mxu0 %v715_v45 }
  0x23   :  { %294 = vmatmul.bf16.vlgmr.msra.gmra.mxu2 %v501_v38 }
  0x25   :  { %392 = vmatpush.bf16.msrb.mxu3 %v700_v44 }
  0x26   :  { %471 = vmatpush.bf16.msrb.mxu0 %v714_v46 }
  0x2a   :  { %472 = vmatpush.bf16.msrb.mxu0 %v713_v47 }
  0x2e   :  { %473 = vmatpush.bf16.msrb.mxu0 %v712_v50 }
  0x32   :  { %474 = vmatpush.bf16.msrb.mxu0 %v711_v5 }
  0x36   :  { %475 = vmatpush.bf16.msrb.mxu0 %v710_v6 }
  0x3a   :  { %476 = vmatpush.bf16.msrb.mxu0 %v709_v7 }
  0x3e   :  { %477 = vmatpush.bf16.msrb.mxu0 %v708_v8 }
  0x8b   :  { %v309_v53 = vpop.f32.mrf.mxu3 }
  0x93   :  { %v311_v0 = vpop.f32.mrf.mxu3 }
  0x9e   :  { %v267_v49 = vpop.f32.mrf.mxu0 }
  0x9f   :  { %v281_v51 = vpop.f32.mrf.mxu1  ;;  %v268_v52 = vadd.f32 %v716_v48, %v267_v49 }
  0xa1   :  { %v282_v55 = vadd.f32 %v281_v51, %v268_v52 }
  0xa6   :  { %v295_v54 = vpop.f32.mrf.mxu2  ;;  %v269_v56 = vpop.f32.mrf.mxu0 }
  0xa7   :  { %v270_v57 = vadd.f32 %v716_v48, %v269_v56  ;;  %v296_v58 = vadd.f32 %v295_v54, %v282_v55  ;;  %v283_v59 = vpop.f32.mrf.mxu1 }
  0xa9   :  { %v284_v60 = vadd.f32 %v283_v59, %v270_v57  ;;  %v310_v62 = vadd.f32 %v309_v53, %v296_v58 }
  0xab   :  { %v314_v2 = vmax.f32 %v310_v62, 0.0 }
  0xae   :  { %v297_v61 = vpop.f32.mrf.mxu2 }
  0xaf   :  { %v298_v63 = vadd.f32 %v297_v61, %v284_v60 }
  0xb1   :  { %v312_v1 = vadd.f32 %v311_v0, %v298_v63 }
  0xb3   :  { %v315_v3 = vmax.f32 %v312_v1, 0.0 }
  0xb5   :  { %v316_v4 = vpack.c.bf16 %v315_v3, %v314_v2 }
  0xb7   :  { %393 = vmatmul.bf16.vlgmr.msrb.gmra.mxu3 %v316_v4 }
 0x13a   :  { %v394_v9 = vpop.f32.mrf.mxu3 }
 0x13b   :  { %v395_v11 = vadd.f32 %v717_v10, %v394_v9 }
 0x13d   :  { %v399_v14 = vmax.f32 %v395_v11, 0.0 }
 0x142   :  { %v396_v12 = vpop.f32.mrf.mxu3 }
 0x143   :  { %v397_v13 = vadd.f32 %v717_v10, %v396_v12 }
 0x145   :  { %v400_v15 = vmax.f32 %v397_v13, 0.0 }
 0x147   :  { %v401_v16 = vpack.c.bf16 %v400_v15, %v399_v14 }
 0x149   :  { %478 = vmatmul.bf16.vlgmr.msrb.gmra.mxu0 %v401_v16 }
 0x1c6   :  { %v479_v18 = vpop.f32.mrf.mxu0 }
 0x1c7   :  { %v480_v19 = vadd.f32 %v718_v17, %v479_v18 }
 0x1c9   :  { %484 = vst [vmem:[%s928_s7] sm:$0xff] %v480_v19 }
 0x1ce   :  { %v481_v20 = vpop.f32.mrf.mxu0 }
 0x1cf   :  { %v482_v21 = vadd.f32 %v718_v17, %v481_v20 }
 0x1d1   :  { %485 = vst [vmem:[%s928_s7 + $0x8] sm:$0xff] %v482_v21 }

</bundles_post_ra>
